<compile_context>
chip_gen: v6e
topology: v6e:2x2x1
jax: 0.10.0
libtpu: 0.0.40
codegen_flags: <defaults>
</compile_context>

<pallas_src>
import functools
import itertools

import numpy as np
import jax
import jax.numpy as jnp
from jax.experimental import pallas as pl
from jax.experimental.pallas import tpu as pltpu

TM_MAX = 512                 # max row tile (points per block)
KC_MAX = 2048                # max contraction block (K*Cin) per grid step
_EPS = 1e-5


def _round_up(n, m):
    return ((n + m - 1) // m) * m


def _vmem_limit():
    """Generation-aware VMEM scoped limit (v7x has only 64 MiB physical)."""
    try:
        cap = getattr(pltpu.get_tpu_info(), "vmem_capacity_bytes", None)
    except Exception:
        cap = None
    if cap is None or cap <= 64 * 1024 * 1024:
        return 48 * 1024 * 1024
    return 96 * 1024 * 1024


_VMEM_LIMIT = _vmem_limit()


def _tile_rows(n):
    """Pad the point count and pick the row tile TM.
    Always produce >= 2 row tiles so the 'parallel' axis can feed both v7x cores."""
    if n >= 2 * TM_MAX:
        return _round_up(n, TM_MAX), TM_MAX
    tm = max(_round_up((n + 1) // 2, 8), 8)
    return 2 * tm, tm


def _pick_kc(k_vol, cin):
    """Contraction blocking: fold offsets into the contraction dim (K*Cin)."""
    kc_raw = k_vol * cin
    kc_block = min(_round_up(kc_raw, 128), KC_MAX)
    kc_pad = _round_up(kc_raw, kc_block)
    return kc_raw, kc_block, kc_pad


# ----------------------------------------------------------------------------
# Pallas kernels
# ----------------------------------------------------------------------------
def _conv_accum_kernel(g_ref, w_ref, o_ref, stats_ref, acc_ref, *, kc, nk):
    """grid = (M_tiles, K_blocks). One lane-dense (tm, kc) x (kc, cout) matmul per
    step into a resident f32 VMEM accumulator; on the last K step store the conv
    output plus the per-tile channel sum / sum-of-squares (global GroupNorm stats).
    The full weight is VMEM-resident (constant index_map); multi-step case slices it."""
    k = pl.program_id(1)

    @pl.when(k == 0)
    def _():
        acc_ref[...] = jnp.zeros_like(acc_ref)

    if nk == 1:
        w = w_ref[...]
    else:
        off = pl.multiple_of(k * kc, kc)
        w = w_ref[pl.ds(off, kc), :]
    acc_ref[...] += jnp.dot(g_ref[...], w, preferred_element_type=jnp.float32)

    @pl.when(k == nk - 1)
    def _():
        acc = acc_ref[...]
        o_ref[...] = acc
        stats_ref[0:1, :] = jnp.sum(acc, axis=0, keepdims=True)
        stats_ref[1:2, :] = jnp.sum(acc * acc, axis=0, keepdims=True)


def _affine_relu_kernel(x_ref, scale_ref, shift_ref, o_ref):
    o_ref[...] = jnp.maximum(x_ref[...] * scale_ref[...] + shift_ref[...], 0.0)


def _affine_relu_res_kernel(x_ref, scale_ref, shift_ref, r_ref, o_ref):
    y = jnp.maximum(x_ref[...] * scale_ref[...] + shift_ref[...], 0.0)
    o_ref[...] = y + r_ref[...]


def _linear_gn_relu_kernel(x_ref, w_ref, b_ref, gamma_ref, beta_ref,
                           sel_ref, selT_ref, o_ref, *, cg, eps):
    """Fused nn.Linear + per-point nn.GroupNorm + ReLU (bottleneck head).
    Two-pass (centered) variance; group reduce/broadcast via tiny one-hot matmuls."""
    h = jnp.dot(x_ref[...], w_ref[...],
                preferred_element_type=jnp.float32) + b_ref[...]
    sel = sel_ref[...]
    selT = selT_ref[...]
    mean_g = jnp.dot(h, sel, preferred_element_type=jnp.float32) * (1.0 / cg)
    mean_c = jnp.dot(mean_g, selT, preferred_element_type=jnp.float32)
    cent = h - mean_c
    var_g = jnp.dot(cent * cent, sel,
                    preferred_element_type=jnp.float32) * (1.0 / cg)
    inv_c = jnp.dot(jax.lax.rsqrt(var_g + eps), selT,
                    preferred_element_type=jnp.float32)
    y = cent * inv_c * gamma_ref[...] + beta_ref[...]
    o_ref[...] = jnp.maximum(y, 0.0)


def _linear_bias_kernel(x_ref, w_ref, b_ref, o_ref):
    o_ref[...] = jnp.dot(x_ref[...], w_ref[...],
                         preferred_element_type=jnp.float32) + b_ref[...]


# ----------------------------------------------------------------------------
# Pallas wrappers
# ----------------------------------------------------------------------------
def sparse_conv(feats_pad, nbr, w2d, kc_block, tm):
    """feats_pad (N_in_pad, Cin) f32, nbr (N_out_pad, K_vol) int32 numpy with misses
    mapped to the appended zero row (index N_in_pad), w2d (KC_pad, Cout) bf16
    (rows beyond K_vol*Cin are zero).  Returns conv output (N_out_pad, Cout) f32
    and per-tile channel sum / sum-of-squares (M_tiles, 2, Cout) f32."""
    n_in_pad, cin = feats_pad.shape
    kc_pad, cout = w2d.shape
    n_out_pad, k_vol = nbr.shape
    kc_raw = k_vol * cin
    assert kc_pad % kc_block == 0 and n_out_pad % tm == 0

    # im2col gather (XLA side): bf16 rows, misses hit the appended zero row,
    # offset axis folded into the contraction dim -> (N_out, K*Cin).
    src = jnp.concatenate(
        [feats_pad.astype(jnp.bfloat16), jnp.zeros((1, cin), jnp.bfloat16)], 0)
    g = jnp.take(src, jnp.asarray(nbr), axis=0)            # (Nout, K, Cin) bf16
    g = g.reshape(n_out_pad, kc_raw)
    if kc_pad != kc_raw:
        g = jnp.pad(g, ((0, 0), (0, kc_pad - kc_raw)))

    n_tiles = n_out_pad // tm
    nk = kc_pad // kc_block
    flops = 2 * n_out_pad * kc_pad * cout
    bytes_accessed = (g.size * 2 + w2d.size * 2 +
                      n_out_pad * cout * 4 + n_tiles * 2 * cout * 4)

    out, stats = pl.pallas_call(
        functools.partial(_conv_accum_kernel, kc=kc_block, nk=nk),
        out_shape=(
            jax.ShapeDtypeStruct((n_out_pad, cout), jnp.float32),
            jax.ShapeDtypeStruct((n_tiles, 2, cout), jnp.float32),
        ),
        grid=(n_tiles, nk),
        in_specs=[
            pl.BlockSpec((tm, kc_block), lambda m, k: (m, k)),
            pl.BlockSpec((kc_pad, cout), lambda m, k: (0, 0)),   # VMEM-resident weight
        ],
        out_specs=(
            pl.BlockSpec((tm, cout), lambda m, k: (m, 0)),
            pl.BlockSpec((None, 2, cout), lambda m, k: (m, 0, 0)),
        ),
        scratch_shapes=[pltpu.VMEM((tm, cout), jnp.float32)],
        compiler_params=pltpu.CompilerParams(
            dimension_semantics=("parallel", "arbitrary"),
            vmem_limit_bytes=_VMEM_LIMIT),
        cost_estimate=pl.CostEstimate(flops=flops, transcendentals=0,
                                      bytes_accessed=bytes_accessed),
    )(g, w2d)
    return out, stats


def _gn_scale_shift(stats, n_real, gamma, beta, num_groups, eps=_EPS):
    """Fold per-tile channel sums into spnn.GroupNorm per-channel scale/shift.
    Tiny ((tiles, 2, C)-sized) XLA glue; padded rows contribute exactly zero."""
    s = jnp.sum(stats, axis=0)                       # (2, C)
    c = gamma.shape[0]
    cg = c // num_groups
    gsum = jnp.sum(s[0].reshape(num_groups, cg), axis=1)
    gsq = jnp.sum(s[1].reshape(num_groups, cg), axis=1)
    cnt = float(n_real * cg)
    mean = gsum / cnt
    var = jnp.maximum(gsq / cnt - mean * mean, 0.0)  # clamp: guards fp cancellation
    inv = jax.lax.rsqrt(var + eps)
    mean_c = jnp.repeat(mean, cg)
    inv_c = jnp.repeat(inv, cg)
    scale = gamma * inv_c
    shift = beta - mean_c * scale
    return scale.reshape(1, c), shift.reshape(1, c)


def gn_finalize(x, scale, shift, residual=None, *, tm):
    """Fused GroupNorm-affine + ReLU (+ optional ResBlock residual add), M-tiled."""
    n_pad, c = x.shape
    n_tiles = n_pad // tm
    in_specs = [
        pl.BlockSpec((tm, c), lambda m: (m, 0)),
        pl.BlockSpec((1, c), lambda m: (0, 0)),
        pl.BlockSpec((1, c), lambda m: (0, 0)),
    ]
    args = [x, scale, shift]
    kern = _affine_relu_kernel
    if residual is not None:
        in_specs.append(pl.BlockSpec((tm, c), lambda m: (m, 0)))
        args.append(residual)
        kern = _affine_relu_res_kernel
    return pl.pallas_call(
        kern,
        out_shape=jax.ShapeDtypeStruct((n_pad, c), jnp.float32),
        grid=(n_tiles,),
        in_specs=in_specs,
        out_specs=pl.BlockSpec((tm, c), lambda m: (m, 0)),
        compiler_params=pltpu.CompilerParams(
            dimension_semantics=("parallel",), vmem_limit_bytes=_VMEM_LIMIT),
    )(*args)


def _group_select(c, g):
    cg = c // g
    sel = np.zeros((c, g), np.float32)
    sel[np.arange(c), np.arange(c) // cg] = 1.0
    return jnp.asarray(sel), jnp.asarray(sel.T)


def linear_gn_relu(x, w, b, gamma, beta, *, num_groups, tm, eps=_EPS):
    n_pad, cin = x.shape
    cin2, h = w.shape
    assert cin == cin2
    cg = h // num_groups
    sel, selT = _group_select(h, num_groups)
    n_tiles = n_pad // tm
    return pl.pallas_call(
        functools.partial(_linear_gn_relu_kernel, cg=float(cg), eps=eps),
        out_shape=jax.ShapeDtypeStruct((n_pad, h), jnp.float32),
        grid=(n_tiles,),
        in_specs=[
            pl.BlockSpec((tm, cin), lambda m: (m, 0)),
            pl.BlockSpec((cin, h), lambda m: (0, 0)),
            pl.BlockSpec((1, h), lambda m: (0, 0)),
            pl.BlockSpec((1, h), lambda m: (0, 0)),
            pl.BlockSpec((1, h), lambda m: (0, 0)),
            pl.BlockSpec((h, num_groups), lambda m: (0, 0)),
            pl.BlockSpec((num_groups, h), lambda m: (0, 0)),
        ],
        out_specs=pl.BlockSpec((tm, h), lambda m: (m, 0)),
        compiler_params=pltpu.CompilerParams(
            dimension_semantics=("parallel",), vmem_limit_bytes=_VMEM_LIMIT),
        cost_estimate=pl.CostEstimate(
            flops=2 * n_pad * cin * h, transcendentals=n_pad * num_groups,
            bytes_accessed=n_pad * cin * 2 + cin * h * 2 + n_pad * h * 4),
    )(x.astype(jnp.bfloat16), w, b.reshape(1, h), gamma.reshape(1, h),
      beta.reshape(1, h), sel, selT)


def linear_bias(x, w, b, *, tm):
    n_pad, cin = x.shape
    _, cout = w.shape
    n_tiles = n_pad // tm
    return pl.pallas_call(
        _linear_bias_kernel,
        out_shape=jax.ShapeDtypeStruct((n_pad, cout), jnp.float32),
        grid=(n_tiles,),
        in_specs=[
            pl.BlockSpec((tm, cin), lambda m: (m, 0)),
            pl.BlockSpec((cin, cout), lambda m: (0, 0)),
            pl.BlockSpec((1, cout), lambda m: (0, 0)),
        ],
        out_specs=pl.BlockSpec((tm, cout), lambda m: (m, 0)),
        compiler_params=pltpu.CompilerParams(
            dimension_semantics=("parallel",), vmem_limit_bytes=_VMEM_LIMIT),
        cost_estimate=pl.CostEstimate(
            flops=2 * n_pad * cin * cout, transcendentals=0,
            bytes_accessed=n_pad * cin * 2 + cin * cout * 2 + n_pad * cout * 4),
    )(x.astype(jnp.bfloat16), w, b.reshape(1, cout))


# ----------------------------------------------------------------------------
# Kernel-map construction (host-side integer bookkeeping, as in torchsparse)
# ----------------------------------------------------------------------------
_BIAS = 1 << 18


def _hash_coords(c):
    c = c.astype(np.int64) + _BIAS
    return (c[:, 0] << 40) | (c[:, 1] << 20) | c[:, 2]


def _build_nbr(in_coords, query_base, offsets, n_out_pad, miss_idx):
    """nbr[i, o] = row index of in_coords matching query_base[i] + offsets[o],
    else miss_idx (an appended all-zero feature row => zero contribution)."""
    keys = _hash_coords(in_coords)
    order = np.argsort(keys)
    skeys = keys[order]
    m = query_base.shape[0]
    k_vol = len(offsets)
    nbr = np.full((n_out_pad, k_vol), miss_idx, np.int32)
    for o, d in enumerate(offsets):
        q = _hash_coords(query_base.astype(np.int64) + np.asarray(d, np.int64))
        pos = np.searchsorted(skeys, q)
        pos = np.minimum(pos, len(skeys) - 1)
        hit = skeys[pos] == q
        nbr[:m, o] = np.where(hit, order[pos], miss_idx).astype(np.int32)
    return nbr


# ----------------------------------------------------------------------------
# Model: parameters + forward
# ----------------------------------------------------------------------------
def _nrm(key, shape, scale=0.1, dtype=jnp.float32):
    return (scale * jax.random.normal(key, shape, jnp.float32)).astype(dtype)


def _conv_block(keys, cin, cout, k):
    k_vol = k ** 3
    kc_raw, kc_block, kc_pad = _pick_kc(k_vol, cin)
    w = _nrm(next(keys), (k_vol, cin, cout))
    # fold the offset axis into the contraction dim; zero-pad to the K block size
    w2d = w.reshape(kc_raw, cout)
    if kc_pad != kc_raw:
        w2d = jnp.concatenate(
            [w2d, jnp.zeros((kc_pad - kc_raw, cout), w2d.dtype)], 0)
    return {
        "k": k,
        "w2d": w2d.astype(jnp.bfloat16),           # bf16 MXU operand, f32 accumulate
        "kc_block": kc_block,
        "gn_w": 1.0 + _nrm(next(keys), (cout,), 0.05),
        "gn_b": _nrm(next(keys), (cout,), 0.05),
        "num_groups": min(8, cout),
    }


def init_params(key, dim_in, dim_out, layers):
    keys = iter(jax.random.split(key, 128))
    params = {
        "stem_conv": _conv_block(keys, dim_in, layers[0], 7),
        "stem_res": {"b0": _conv_block(keys, layers[0], layers[0], 3),
                     "b1": _conv_block(keys, layers[0], layers[0], 3)},
        "blocks": [],
    }
    for i in range(len(layers) - 1):
        params["blocks"].append({
            "down": _conv_block(keys, layers[i], layers[i + 1], 2),
            "res1": {"b0": _conv_block(keys, layers[i + 1], layers[i + 1], 3),
                     "b1": _conv_block(keys, layers[i + 1], layers[i + 1], 3)},
            "res2": {"b0": _conv_block(keys, layers[i + 1], layers[i + 1], 3),
                     "b1": _conv_block(keys, layers[i + 1], layers[i + 1], 3)},
        })
    h = 2 * layers[-1]
    params["bottleneck"] = {
        # pre-transposed (in, out) layouts: no per-forward .T copies
        "w1": _nrm(next(keys), (layers[-1], h), dtype=jnp.bfloat16),
        "b1": _nrm(next(keys), (h,)),
        "gn_w": 1.0 + _nrm(next(keys), (h,), 0.05),
        "gn_b": _nrm(next(keys), (h,), 0.05),
        "w2": _nrm(next(keys), (h, dim_out), dtype=jnp.bfloat16),
        "b2": _nrm(next(keys), (dim_out,)),
    }
    return params


def conv_gn_relu(feats_pad, n_real, coords, p, stride=1, residual=None):
    """spnn.Conv3d -> spnn.GroupNorm -> ReLU (optionally + residual, fused)."""
    k = p["k"]
    if stride == 1:                      # submanifold conv: out coords == in coords
        r = k // 2
        offsets = list(itertools.product(range(-r, r + 1), repeat=3))
        out_coords = coords
        query = coords
    else:                                # kernel=2, stride=2 downscale
        out_coords = np.unique(coords // 2, axis=0).astype(np.int32)
        offsets = list(itertools.product(range(2), repeat=3))
        query = out_coords * 2
    n_out = out_coords.shape[0]
    n_out_pad, tm = _tile_rows(n_out)
    nbr = _build_nbr(coords, query, offsets, n_out_pad,
                     miss_idx=feats_pad.shape[0])
    conv_out, stats = sparse_conv(feats_pad, nbr, p["w2d"], p["kc_block"], tm)
    scale, shift = _gn_scale_shift(stats, n_out, p["gn_w"], p["gn_b"],
                                   p["num_groups"])
    out = gn_finalize(conv_out, scale, shift, residual=residual, tm=tm)
    return out, out_coords, n_out, n_out_pad, tm


def resblock(feats_pad, n_real, coords, p):
    # ResBlockSparse: x + block1(block0(x)); ReLU is inside each block, so the
    # residual add after the second block's ReLU matches the PyTorch reference.
    out, _, _, _, _ = conv_gn_relu(feats_pad, n_real, coords, p["b0"])
    out, _, _, _, _ = conv_gn_relu(out, n_real, coords, p["b1"],
                                   residual=feats_pad)  # residual fused in epilogue
    return out


def resnet3d_sparse_forward(params, coords, feats):
    coords = np.asarray(coords, np.int32)
    n = coords.shape[0]
    n_pad, tm = _tile_rows(n)
    f = jnp.pad(feats.astype(jnp.float32), ((0, n_pad - n), (0, 0)))

    f, coords, n, n_pad, tm = conv_gn_relu(f, n, coords, params["stem_conv"])
    f = resblock(f, n, coords, params["stem_res"])

    for blk in params["blocks"]:
        f, coords, n, n_pad, tm = conv_gn_relu(f, n, coords, blk["down"], stride=2)
        f = resblock(f, n, coords, blk["res1"])
        f = resblock(f, n, coords, blk["res2"])

    bp = params["bottleneck"]
    f = linear_gn_relu(f, bp["w1"], bp["b1"], bp["gn_w"], bp["gn_b"],
                       num_groups=8, tm=tm)
    f = linear_bias(f, bp["w2"], bp["b2"], tm=tm)
    return coords, f[:n]


if __name__ == "__main__":
    key = jax.random.PRNGKey(0)
    k_coords, k_feats, k_params = jax.random.split(key, 3)

    dim_in, dim_out, layers = 4, 32, (8, 16)

    # ~64 unique voxel coords in a 16^3 grid (single batch sample)
    raw = np.asarray(jax.random.randint(k_coords, (128, 3), 0, 16))
    coords = np.unique(raw, axis=0)[:64].astype(np.int32)
    n = coords.shape[0]
    feats = jax.random.normal(k_feats, (n, dim_in), jnp.float32)

    params = init_params(k_params, dim_in, dim_out, layers)

    out_coords, out_feats = resnet3d_sparse_forward(params, coords, feats)
    out_feats = jax.block_until_ready(out_feats)

    assert out_feats.shape == (out_coords.shape[0], dim_out), out_feats.shape
    assert bool(jnp.all(jnp.isfinite(out_feats)))
    print("KERNEL_OK")
</pallas_src>

<mosaic_0001>
module attributes {stable_mosaic.version = 11 : i64} {
  func.func @_conv_accum_kernel(%arg0: i32, %arg1: i32, %arg2: memref<32x1408xbf16, #tpu.memory_space<vmem>>, %arg3: memref<1408x8xbf16, #tpu.memory_space<vmem>>, %arg4: memref<32x8xf32, #tpu.memory_space<vmem>>, %arg5: memref<1x2x8xf32, #tpu.memory_space<vmem>>, %arg6: memref<32x8xf32, #tpu.memory_space<vmem>>) attributes {dimension_semantics = [#tpu.dimension_semantics<parallel>, #tpu.dimension_semantics<arbitrary>], iteration_bounds = array<i64: 2, 1>, scalar_prefetch = 0 : i64, scratch_operands = 1 : i64, tpu.core_type = #tpu.core_type<tc>, window_params = [{transform_indices = @transform_0, window_bounds = array<i64: 32, 1408>}, {pipeline_mode = #tpu.pipeline_mode<synchronous>, transform_indices = @transform_1, window_bounds = array<i64: 1408, 8>}, {transform_indices = @transform_2, window_bounds = array<i64: 32, 8>}, {transform_indices = @transform_3, window_bounds = array<i64: 1, 2, 8>}]} {
    %c0_i32 = arith.constant 0 : i32
    %0 = arith.cmpi eq, %arg1, %c0_i32 : i32
    %1 = arith.extui %0 : i1 to i32
    %c0_i32_0 = arith.constant 0 : i32
    %2 = arith.cmpi ne, %1, %c0_i32_0 : i32
    scf.if %2 {
      %cst_10 = arith.constant 0.000000e+00 : f32
      %12 = vector.broadcast %cst_10 : f32 to vector<32x8xf32>
      %c0_11 = arith.constant 0 : index
      %c0_12 = arith.constant 0 : index
      %13 = vector.load %arg6[%c0_11, %c0_12] : memref<32x8xf32, #tpu.memory_space<vmem>>, vector<32x8xf32>
      tpu.vector_store %arg6[%c0_11, %c0_12], %12 {strides = array<i32>} : memref<32x8xf32, #tpu.memory_space<vmem>>, vector<32x8xf32>,
    } else {
    }
    %c0 = arith.constant 0 : index
    %c0_1 = arith.constant 0 : index
    %3 = vector.load %arg3[%c0, %c0_1] : memref<1408x8xbf16, #tpu.memory_space<vmem>>, vector<1408x8xbf16>
    %c0_2 = arith.constant 0 : index
    %c0_3 = arith.constant 0 : index
    %4 = vector.load %arg6[%c0_2, %c0_3] : memref<32x8xf32, #tpu.memory_space<vmem>>, vector<32x8xf32>
    %c0_4 = arith.constant 0 : index
    %c0_5 = arith.constant 0 : index
    %5 = vector.load %arg2[%c0_4, %c0_5] : memref<32x1408xbf16, #tpu.memory_space<vmem>>, vector<32x1408xbf16>
    %cst = arith.constant dense<0.000000e+00> : vector<32x8xf32>
    %6 = tpu.matmul %5, %3, %cst {dimension_numbers = #tpu.dot_dimension_numbers<[1], [0], [0], [1], [0, 0, 1, 1], [], []>} : vector<32x1408xbf16>, vector<1408x8xbf16>, vector<32x8xf32> -> vector<32x8xf32>
    %7 = arith.addf %4, %6 : vector<32x8xf32>
    %c0_6 = arith.constant 0 : index
    %c0_7 = arith.constant 0 : index
    %8 = vector.load %arg6[%c0_6, %c0_7] : memref<32x8xf32, #tpu.memory_space<vmem>>, vector<32x8xf32>
    tpu.vector_store %arg6[%c0_6, %c0_7], %7 {strides = array<i32>} : memref<32x8xf32, #tpu.memory_space<vmem>>, vector<32x8xf32>,
    %c0_i32_8 = arith.constant 0 : i32
    %9 = arith.cmpi eq, %arg1, %c0_i32_8 : i32
    %10 = arith.extui %9 : i1 to i32
    %c0_i32_9 = arith.constant 0 : i32
    %11 = arith.cmpi ne, %10, %c0_i32_9 : i32
    scf.if %11 {
      %c0_10 = arith.constant 0 : index
      %c0_11 = arith.constant 0 : index
      %12 = vector.load %arg6[%c0_10, %c0_11] : memref<32x8xf32, #tpu.memory_space<vmem>>, vector<32x8xf32>
      %c0_12 = arith.constant 0 : index
      %c0_13 = arith.constant 0 : index
      %13 = vector.load %arg4[%c0_12, %c0_13] : memref<32x8xf32, #tpu.memory_space<vmem>>, vector<32x8xf32>
      tpu.vector_store %arg4[%c0_12, %c0_13], %12 {strides = array<i32>} : memref<32x8xf32, #tpu.memory_space<vmem>>, vector<32x8xf32>,
      %cst_14 = arith.constant dense<0.000000e+00> : vector<8xf32>
      %14 = vector.multi_reduction <add>, %12, %cst_14 [0] : vector<32x8xf32> to vector<8xf32>
      %15 = vector.shape_cast %14 : vector<8xf32> to vector<1x8xf32>
      %c0_15 = arith.constant 0 : index
      %c0_16 = arith.constant 0 : index
      %c0_17 = arith.constant 0 : index
      %16 = vector.load %arg5[%c0_15, %c0_16, %c0_17] : memref<1x2x8xf32, #tpu.memory_space<vmem>>, vector<1x1x8xf32>
      %17 = vector.shape_cast %16 : vector<1x1x8xf32> to vector<1x8xf32>
      %18 = vector.shape_cast %15 : vector<1x8xf32> to vector<1x1x8xf32>
      tpu.vector_store %arg5[%c0_15, %c0_16, %c0_17], %18 {strides = array<i32>} : memref<1x2x8xf32, #tpu.memory_space<vmem>>, vector<1x1x8xf32>,
      %19 = arith.mulf %12, %12 : vector<32x8xf32>
      %cst_18 = arith.constant dense<0.000000e+00> : vector<8xf32>
      %20 = vector.multi_reduction <add>, %19, %cst_18 [0] : vector<32x8xf32> to vector<8xf32>
      %21 = vector.shape_cast %20 : vector<8xf32> to vector<1x8xf32>
      %c0_19 = arith.constant 0 : index
      %c1 = arith.constant 1 : index
      %c0_20 = arith.constant 0 : index
      %22 = vector.load %arg5[%c0_19, %c1, %c0_20] : memref<1x2x8xf32, #tpu.memory_space<vmem>>, vector<1x1x8xf32>
      %23 = vector.shape_cast %22 : vector<1x1x8xf32> to vector<1x8xf32>
      %24 = vector.shape_cast %21 : vector<1x8xf32> to vector<1x1x8xf32>
      tpu.vector_store %arg5[%c0_19, %c1, %c0_20], %24 {strides = array<i32>} : memref<1x2x8xf32, #tpu.memory_space<vmem>>, vector<1x1x8xf32>,
    } else {
    }
    return
  }
  func.func @transform_0(%arg0: i32, %arg1: i32) -> (i32, i32) {
    %c0_i32 = arith.constant 0 : i32
    return %arg0, %arg1 : i32, i32
  }
  func.func @transform_1(%arg0: i32, %arg1: i32) -> (i32, i32) {
    %c0_i32 = arith.constant 0 : i32
    %c0_i32_0 = arith.constant 0 : i32
    %c0_i32_1 = arith.constant 0 : i32
    return %c0_i32, %c0_i32_0 : i32, i32
  }
  func.func @transform_2(%arg0: i32, %arg1: i32) -> (i32, i32) {
    %c0_i32 = arith.constant 0 : i32
    %c0_i32_0 = arith.constant 0 : i32
    return %arg0, %c0_i32 : i32, i32
  }
  func.func @transform_3(%arg0: i32, %arg1: i32) -> (i32, i32, i32) {
    %c0_i32 = arith.constant 0 : i32
    %c0_i32_0 = arith.constant 0 : i32
    %c0_i32_1 = arith.constant 0 : i32
    return %arg0, %c0_i32, %c0_i32_0 : i32, i32, i32
  }
}

</mosaic_0001>

<bundles_post_ra>
// kernel: tpu_custom_call.1
= control target key start
LH: loop header
LB: loop body
LE: loop exit
PB: predicated region body
PF: predicated region fallthrough
CT: control target
= control target key end

     0   :  { %9 = vsyncpa [#allocation4], 0  ;;  %s2522_s0 = inlined_call_operand.vmem [shape: bf16[64,1408], index: 0, kind: input, shape index: {}]   ;;  %s2523_s1 = inlined_call_operand.vmem [shape: bf16[1408,8], index: 1, kind: input, shape index: {}]   ;;  %s2524_s2 = inlined_call_operand.vmem [shape: f32[64,8], index: 2, kind: output, shape index: {0}]   ;;  %s2525_s3 = inlined_call_operand.hbm [shape: f32[2,2,8], index: 3, kind: output, shape index: {1}]  }
   0x1   :  { %11 = vsyncpa [#allocation4 + $0x1], 0  ;;  %s2109_s12 = smov 0   ;;  %s2111_s13 = smov 0  }
   0x2   :  { %s2113_s14 = smov 0   ;;  %s2115_s15 = smov 0  }
   0x3   :  { %s2117_s16 = smov 0   ;;  %s2119_s17 = smov 0  }
   0x4 LB: > { %s1538_s18 = sadd.s32 4294967295, %s2085_s17   ;;  %s1539_s19 = sadd.s32 4294967294, %s2085_s17   ;;  %s2085_s17 = sphi %s2119_s17, %s17_s17   ;;  %s2081_s16 = sphi %s2117_s16, %s2532_s16   ;;  %s2077_s15 = sphi %s2115_s15, %s2531_s15   ;;  %s2073_s14 = sphi %s2113_s14, %s2530_s14   ;;  %s2069_s13 = sphi %s2111_s13, %s2529_s13   ;;  %s2065_s12 = sphi %s2109_s12, %s2528_s12  }
   0x5   : > { %s29_s20 = sadd.s32 1, %s2081_s16  ;;  %s111_s21 = sadd.s32 1, %s2073_s14 }
   0x6   : > { %p31_p0 = scmp.ge.s32.totalorder %s29_s20, 2  ;;  %p121_p1 = scmp.ne.s32.totalorder %s2073_s14, %s2069_s13 }
   0x7   : > { %p122_p2 = scmp.eq.s32.totalorder %s1538_s18, 1  ;;  %p127_p3 = scmp.ne.s32.totalorder %s2069_s13, %s2065_s12 }
   0x8   : > { %s2534_s20 = smov (%p31_p0, %s29_s20), 0  ;;  %p128_p5 = scmp.eq.s32.totalorder %s1539_s19, 1 }
   0x9   : > { %p2149_p4 = por %p122_p2, %p121_p1  ;;  %s108_s23 = ssub.s32 %s2081_s16, %s2534_s20 }
   0xa   : > { %p1542_p6 = scmp.ge.s32.totalorder %s2085_s17, 1  ;;  %p109_p7 = scmp.eq.s32.totalorder %s108_s23, 0 }
   0xb   : > { %p2156_p8 = por %p128_p5, %p127_p3  ;;  %p164_p9 = scmp.lt.s32.totalorder %s2085_s17, 3 }
   0xc   : > { %s2162_s25 = scalar_select %p109_p7, %s2073_s14, %s111_s21  }
   0xd   : > { %p165_p10 = pnand %p1542_p6, %p164_p9 }
   0xe   : > { %s1544_s18 = sshll.u32 (!%p165_p10), %s2077_s15, 2  ;;  %s1659_s23 = sshll.u32 (!%p165_p10), %s2077_s15, 5 }
   0xf   : > { %168 = sbr.rel (%p165_p10) target bundleno = 371 (0x173), region = 28  ;;  %p200_p11 = scmp.lt.s32.totalorder (!%p165_p10), %s1544_s18, 7 }
  0x10   : > { %s1438_s30 = scalar_lea.hbm (!%p165_p10), %s2525_s3, %s1659_s23  ;;  %s2088_s6 = smov (!%p165_p10), [#allocation3]  }
  0x11   : > { %s2013_s15 = sshll.u32 (!%p165_p10), %s2088_s6, 4  ;;  %s2014_s15 = int_to_ptr.vmem [resolvable:$false] %s2013_s15 }
  0x12   : > { %s2015_s7 = scalar_lea.vmem (!%p165_p10), %s2014_s15, 64 }
  0x14   : > { %v1889_v0 = vld [vmem:[%s2523_s1 + $0x78] sm:$0xff]   ;;  %v1893_v4 = vld [vmem:[%s2523_s1 + $0x70] sm:$0xff]   ;;  %v1897_v8 = vld [vmem:[%s2523_s1 + $0x68] sm:$0xff]   ;;  %s2536_s18 = smov (!%p200_p11, %s1544_s18), 7  ;;  %vm221_vm0 = vcmask 64512   ;;  %vm1397_vm1 = vcmask 57344  }
  0x15   : > { %v1890_v1 = vld [vmem:[%s2523_s1 + $0xf8] sm:$0xff]   ;;  %1662 = vmatprep.subr.bf16.mxu0 %v1889_v0  ;;  %v1894_v5 = vld [vmem:[%s2523_s1 + $0xf0] sm:$0xff]   ;;  %v1898_v9 = vld [vmem:[%s2523_s1 + $0xe8] sm:$0xff]   ;;  %s1832_s29 = smul.u32 44, %s2536_s18 }
  0x16   : > { %v1891_v2 = vld [vmem:[%s2523_s1 + $0x38] sm:$0xff]   ;;  %1690 = vmatprep.subr.bf16.mxu1 %v1890_v1  ;;  %v1895_v6 = vld [vmem:[%s2523_s1 + $0x30] sm:$0xff]   ;;  %v1899_v10 = vld [vmem:[%s2523_s1 + $0x28] sm:$0xff]  }
  0x17   : > { %v1892_v3 = vld [vmem:[%s2523_s1 + $0xb8] sm:$0xff]   ;;  %1663 = vmatpush3.bf16.msra.mxu0 %v1891_v2  ;;  %v1896_v7 = vld [vmem:[%s2523_s1 + $0xb0] sm:$0xff]   ;;  %v1900_v11 = vld [vmem:[%s2523_s1 + $0xa8] sm:$0xff]   ;;  %s2261_s21 = scalar_lea.vmem %s2522_s0, %s1832_s29 }
  0x18   : > { %1691 = vmatpush3.bf16.msra.mxu1 %v1892_v3  ;;  %1664 = vmatprep.subr.bf16.mxu0 %v1893_v4  ;;  %v1901_v12 = vld [vmem:[%s2523_s1 + $0x60] sm:$0xff]   ;;  %v1905_v16 = vld [vmem:[%s2523_s1 + $0x58] sm:$0xff]   ;;  %v1909_v20 = vld [vmem:[%s2523_s1 + $0x50] sm:$0xff]  }
  0x19   : > { %1692 = vmatprep.subr.bf16.mxu1 %v1894_v5  ;;  %v1902_v13 = vld [vmem:[%s2523_s1 + $0xe0] sm:$0xff]   ;;  %v1906_v17 = vld [vmem:[%s2523_s1 + $0xd8] sm:$0xff]   ;;  %v1910_v21 = vld [vmem:[%s2523_s1 + $0xd0] sm:$0xff]  }
  0x1a   : > { %v1903_v14 = vld [vmem:[%s2523_s1 + $0x20] sm:$0xff]   ;;  %v1907_v18 = vld [vmem:[%s2523_s1 + $0x18] sm:$0xff]   ;;  %v1911_v22 = vld [vmem:[%s2523_s1 + $0x10] sm:$0xff]  }
  0x1b   : > { %1665 = vmatpush3.bf16.msra.mxu0 %v1895_v6  ;;  %v1904_v15 = vld [vmem:[%s2523_s1 + $0xa0] sm:$0xff]   ;;  %v1908_v19 = vld [vmem:[%s2523_s1 + $0x98] sm:$0xff]   ;;  %v1912_v23 = vld [vmem:[%s2523_s1 + $0x90] sm:$0xff]  }
  0x1c   : > { %1693 = vmatpush3.bf16.msra.mxu1 %v1896_v7  ;;  %1666 = vmatprep.subr.bf16.mxu0 %v1897_v8  ;;  %v1913_v24 = vld [vmem:[%s2523_s1 + $0x48] sm:$0xff]   ;;  %v1917_v28 = vld [vmem:[%s2523_s1 + $0x40] sm:$0xff]   ;;  %v1927_v36 = vld [vmem:[%s2523_s1 + $0x178] sm:$0xff]  }
  0x1d   : > { %1694 = vmatprep.subr.bf16.mxu1 %v1898_v9  ;;  %v1914_v25 = vld [vmem:[%s2523_s1 + $0xc8] sm:$0xff]   ;;  %v1918_v29 = vld [vmem:[%s2523_s1 + $0xc0] sm:$0xff]   ;;  %v1928_v37 = vld [vmem:[%s2523_s1 + $0x138] sm:$0xff]  }
  0x1e   : > { %v1915_v26 = vld [vmem:[%s2523_s1 + $0x8] sm:$0xff]   ;;  %v1919_v30 = vld [vmem:[%s2523_s1] sm:$0xff]   ;;  %v1929_v38 = vld [vmem:[%s2523_s1 + $0x1f8] sm:$0xff]  }
  0x1f   : > { %1667 = vmatpush3.bf16.msra.mxu0 %v1899_v10  ;;  %v1916_v27 = vld [vmem:[%s2523_s1 + $0x88] sm:$0xff]   ;;  %v1920_v31 = vld [vmem:[%s2523_s1 + $0x80] sm:$0xff]   ;;  %v1930_v39 = vld [vmem:[%s2523_s1 + $0x1b8] sm:$0xff]  }
  0x20   : > { %1695 = vmatpush3.bf16.msra.mxu1 %v1900_v11  ;;  %1668 = vmatprep.subr.bf16.mxu0 %v1901_v12  ;;  %v1921_v32 = vld [vmem:[%s2261_s21] ss:$44 sps:$4 sm:$0xff]   ;;  %v1923_v33 = vld [vmem:[%s2261_s21 + $0x4] ss:$44 sps:$4 sm:$0xff]   ;;  %v1924_v34 = vld [vmem:[%s2261_s21 + $0x8] ss:$44 sps:$4 sm:$0xff]  }
  0x21   : > { %1696 = vmatprep.subr.bf16.mxu1 %v1902_v13  ;;  %v1926_v35 = vld [vmem:[%s2261_s21 + $0xc] ss:$44 sps:$4 sm:$0xff]   ;;  %1102 = vmatprep.mubr.bf16.mxu0 %v1923_v33  ;;  %v1931_v40 = vld [vmem:[%s2523_s1 + $0x170] sm:$0xff]   ;;  %v1939_v48 = vld [vmem:[%s2523_s1 + $0x160] sm:$0xff]  }
  0x22   : > { %1151 = vmatprep.mubr.bf16.mxu1 %v1926_v35  ;;  %v1932_v41 = vld [vmem:[%s2523_s1 + $0x130] sm:$0xff]   ;;  %v1935_v44 = vld [vmem:[%s2523_s1 + $0x168] sm:$0xff]   ;;  %v1940_v49 = vld [vmem:[%s2523_s1 + $0x120] sm:$0xff]  }
  0x23   : > { %1669 = vmatpush3.bf16.msra.mxu0 %v1903_v14  ;;  %v1933_v42 = vld [vmem:[%s2523_s1 + $0x1f0] sm:$0xff]   ;;  %v1936_v45 = vld [vmem:[%s2523_s1 + $0x128] sm:$0xff]   ;;  %v1941_v50 = vld [vmem:[%s2523_s1 + $0x1e0] sm:$0xff]  }
  0x24   : > { %1697 = vmatpush3.bf16.msra.mxu1 %v1904_v15  ;;  %1670 = vmatprep.subr.bf16.mxu0 %v1905_v16  ;;  %v1934_v43 = vld [vmem:[%s2523_s1 + $0x1b0] sm:$0xff]   ;;  %v1937_v46 = vld [vmem:[%s2523_s1 + $0x1e8] sm:$0xff]   ;;  %v1942_v51 = vld [vmem:[%s2523_s1 + $0x1a0] sm:$0xff]  }
  0x25   : > { %1698 = vmatprep.subr.bf16.mxu1 %v1906_v17  ;;  %v1938_v47 = vld [vmem:[%s2523_s1 + $0x1a8] sm:$0xff]   ;;  %v1943_v52 = vld [vmem:[%s2523_s1 + $0x158] sm:$0xff]   ;;  %v1947_v55 = vld [vmem:[%s2261_s21 + $0x64] ss:$44 sps:$4 sm:$0xff]  }
  0x26   : > { %v1944_v53 = vld [vmem:[%s2523_s1 + $0x118] sm:$0xff]   ;;  %v1951_v58 = vld [vmem:[%s2261_s21 + $0x60] ss:$44 sps:$4 sm:$0xff]   ;;  %v1953_v60 = vld [vmem:[%s2523_s1 + $0x150] sm:$0xff]  }
  0x27   : > { %1671 = vmatpush3.bf16.msra.mxu0 %v1907_v18  ;;  %v1945_v54 = vld [vmem:[%s2261_s21 + $0x5c] ss:$44 sps:$4 sm:$0xff]   ;;  %v1950_v57 = vld [vmem:[%s2261_s21 + $0x58] ss:$44 sps:$4 sm:$0xff]   ;;  %v1954_v61 = vld [vmem:[%s2523_s1 + $0x110] sm:$0xff]  }
  0x28   : > { %1699 = vmatpush3.bf16.msra.mxu1 %v1908_v19  ;;  %1672 = vmatprep.subr.bf16.mxu0 %v1909_v20  ;;  %v1949_v56 = vld [vmem:[%s2523_s1 + $0x1d8] sm:$0xff]   ;;  %v1955_v62 = vld [vmem:[%s2523_s1 + $0x1d0] sm:$0xff]   ;;  %v1957_v0 = vld [vmem:[%s2523_s1 + $0x148] sm:$0xff]  }
  0x29   : > { %1700 = vmatprep.subr.bf16.mxu1 %v1910_v21  ;;  %v1952_v59 = vld [vmem:[%s2523_s1 + $0x198] sm:$0xff]   ;;  %v1956_v63 = vld [vmem:[%s2523_s1 + $0x190] sm:$0xff]   ;;  %v1958_v1 = vld [vmem:[%s2523_s1 + $0x108] sm:$0xff]  }
  0x2a   : > { %v1959_v2 = vld [vmem:[%s2523_s1 + $0x1c8] sm:$0xff]   ;;  %v1961_v4 = vld [vmem:[%s2523_s1 + $0x140] sm:$0xff]   ;;  %v1964_v7 = vld [vmem:[%s2261_s21 + $0x10] ss:$44 sps:$4 sm:$0xff]  }
  0x2b   : > { %1673 = vmatpush3.bf16.msra.mxu0 %v1911_v22  ;;  %v1960_v3 = vld [vmem:[%s2523_s1 + $0x188] sm:$0xff]   ;;  %v1962_v5 = vld [vmem:[%s2523_s1 + $0x100] sm:$0xff]   ;;  %v1968_v10 = vld [vmem:[%s2523_s1 + $0x278] sm:$0xff]  }
  0x2c   : > { %1701 = vmatpush3.bf16.msra.mxu1 %v1912_v23  ;;  %1674 = vmatprep.subr.bf16.mxu0 %v1913_v24  ;;  %v1963_v6 = vld [vmem:[%s2523_s1 + $0x1c0] sm:$0xff]   ;;  %v1971_v12 = vld [vmem:[%s2261_s21 + $0x1c] ss:$44 sps:$4 sm:$0xff]   ;;  %v1974_v15 = vld [vmem:[%s2523_s1 + $0x270] sm:$0xff]  }
  0x2d   : > { %1702 = vmatprep.subr.bf16.mxu1 %v1914_v25  ;;  %v1966_v8 = vld [vmem:[%s2261_s21 + $0x14] ss:$44 sps:$4 sm:$0xff]   ;;  %v1969_v11 = vld [vmem:[%s2261_s21 + $0x18] ss:$44 sps:$4 sm:$0xff]   ;;  %v1980_v20 = vld [vmem:[%s2523_s1 + $0x268] sm:$0xff]  }
  0x2e   : > { %v1967_v9 = vld [vmem:[%s2523_s1 + $0x180] sm:$0xff]   ;;  %v1972_v13 = vld [vmem:[%s2523_s1 + $0x238] sm:$0xff]   ;;  %v1975_v16 = vld [vmem:[%s2523_s1 + $0x230] sm:$0xff]  }
  0x2f   : > { %1675 = vmatpush3.bf16.msra.mxu0 %v1915_v26  ;;  %v1973_v14 = vld [vmem:[%s2523_s1 + $0x2b8] sm:$0xff]   ;;  %v1976_v17 = vld [vmem:[%s2523_s1 + $0x2b0] sm:$0xff]   ;;  %v1983_v22 = vld [vmem:[%s2523_s1 + $0x228] sm:$0xff]  }
  0x30   : > { %1703 = vmatpush3.bf16.msra.mxu1 %v1916_v27  ;;  %1676 = vmatprep.subr.bf16.mxu0 %v1917_v28  ;;  %v1977_v18 = vld [vmem:[%s2261_s21 + $0x6c] ss:$44 sps:$4 sm:$0xff]   ;;  %v1979_v19 = vld [vmem:[%s2261_s21 + $0x68] ss:$44 sps:$4 sm:$0xff]   ;;  %v1984_v23 = vld [vmem:[%s2261_s21 + $0x70] ss:$44 sps:$4 sm:$0xff]  }
  0x31   : > { %1704 = vmatprep.subr.bf16.mxu1 %v1918_v29  ;;  %v1981_v21 = vld [vmem:[%s2261_s21 + $0x74] ss:$44 sps:$4 sm:$0xff]   ;;  %v1985_v24 = vld [vmem:[%s2523_s1 + $0x2a8] sm:$0xff]   ;;  %v1989_v28 = vld [vmem:[%s2523_s1 + $0x258] sm:$0xff]  }
  0x32   : > { %v1986_v25 = vld [vmem:[%s2523_s1 + $0x260] sm:$0xff]   ;;  %v1990_v29 = vld [vmem:[%s2523_s1 + $0x218] sm:$0xff]   ;;  %v1994_v33 = vld [vmem:[%s2523_s1 + $0x290] sm:$0xff]  }
  0x33   : > { %1677 = vmatpush3.bf16.msra.mxu0 %v1919_v30  ;;  %v1987_v26 = vld [vmem:[%s2523_s1 + $0x220] sm:$0xff]   ;;  %v1991_v30 = vld [vmem:[%s2523_s1 + $0x298] sm:$0xff]   ;;  %v1997_v35 = vld [vmem:[%s2523_s1 + $0x288] sm:$0xff]  }
  0x34   : > { %1705 = vmatpush3.bf16.msra.mxu1 %v1920_v31  ;;  %1718 = vmatprep.subr.bf16.mxu0 %v1927_v36  ;;  %v1988_v27 = vld [vmem:[%s2523_s1 + $0x2a0] sm:$0xff]   ;;  %v1992_v31 = vld [vmem:[%s2523_s1 + $0x250] sm:$0xff]   ;;  %v1996_v36 = vld [vmem:[%s2523_s1 + $0x208] sm:$0xff]  }
  0x35   : > { %1746 = vmatprep.subr.bf16.mxu1 %v1929_v38  ;;  %v1999_v38 = vld [vmem:[%s2523_s1 + $0x200] sm:$0xff]  }
  0x36   : > { %1103 = vmatmul.mubr.bf16.vlgmr.msra.gmra.mxu0 %v1921_v32  ;;  %v1993_v32 = vld [vmem:[%s2523_s1 + $0x210] sm:$0xff]  }
  0x37   : > { %1152 = vmatmul.mubr.bf16.vlgmr.msra.gmra.mxu1 %v1924_v34  ;;  %1719 = vmatpush3.bf16.msra.mxu0 %v1928_v37  ;;  %v1995_v34 = vld [vmem:[%s2523_s1 + $0x248] sm:$0xff]   ;;  %v1998_v37 = vld [vmem:[%s2523_s1 + $0x240] sm:$0xff]  }
  0x38   : > { %1747 = vmatpush3.bf16.msra.mxu1 %v1930_v39  ;;  %1720 = vmatprep.subr.bf16.mxu0 %v1931_v40  ;;  %v2000_v39 = vld [vmem:[%s2523_s1 + $0x280] sm:$0xff]  }
  0x39   : > { %1748 = vmatprep.subr.bf16.mxu1 %v1933_v42  ;;  %1110 = vmatprep.mubr.bf16.mxu0 %v1945_v54  ;;  %v2003_v40 = vld [vmem:[%s2261_s21 + $0x24] ss:$44 sps:$4 sm:$0xff]   ;;  %v2001_v42 = vld [vmem:[%s2261_s21 + $0x20] ss:$44 sps:$4 sm:$0xff]  }
  0x3a   : > { %1159 = vmatprep.mubr.bf16.mxu1 %v1947_v55 }
  0x3b   : > { %1721 = vmatpush3.bf16.msra.mxu0 %v1932_v41  ;;  %v2004_v41 = vld [vmem:[%s2261_s21 + $0x28] ss:$44 sps:$4 sm:$0xff]  }
  0x3c   : > { %1749 = vmatpush3.bf16.msra.mxu1 %v1934_v43  ;;  %1722 = vmatprep.subr.bf16.mxu0 %v1935_v44  ;;  %v2006_v43 = vld [vmem:[%s2261_s21 + $0x7c] ss:$44 sps:$4 sm:$0xff]   ;;  %v2005_v44 = vld [vmem:[%s2261_s21 + $0x80] ss:$44 sps:$4 sm:$0xff]  }
  0x3d   : > { %1750 = vmatprep.subr.bf16.mxu1 %v1937_v46  ;;  %v2087_v46 = vmov 0.0  }
  0x3e   : > { %1111 = vmatmul.mubr.bf16.gmra.mxu0 %v1950_v57  ;;  %222 = vst.msk [vmem:[#allocation2] sm:$0xff] %vm221_vm0, %v2087_v46  ;;  %223 = vst.msk [vmem:[#allocation2 + $0x8] sm:$0xff] %vm221_vm0, %v2087_v46 }
  0x3f   : > { %1723 = vmatpush3.bf16.msra.mxu0 %v1936_v45  ;;  %1160 = vmatmul.mubr.bf16.gmra.mxu1 %v1951_v58  ;;  %v2008_v45 = vld [vmem:[%s2261_s21 + $0x78] ss:$44 sps:$4 sm:$0xff]   ;;  %224 = vst.msk [vmem:[#allocation2 + $0x10] sm:$0xff] %vm221_vm0, %v2087_v46  ;;  %225 = vst.msk [vmem:[#allocation2 + $0x18] sm:$0xff] %vm221_vm0, %v2087_v46  ;;  %s1547_s21 = sshll.u32 %s2536_s18, 3  ;;  %s195_s18 = sand.u32 1, %s2069_s13  }
  0x40   : > { %1751 = vmatpush3.bf16.msra.mxu1 %v1938_v47  ;;  %1724 = vmatprep.subr.bf16.mxu0 %v1939_v48  ;;  %s214_s11 = scalar_lea.vmem %s2524_s2, %s1547_s21  ;;  %s1543_s19 = sshll.u32 %s195_s18, 1 }
  0x41   : > { %1752 = vmatprep.subr.bf16.mxu1 %v1941_v50  ;;  %1200 = vmatprep.mubr.bf16.mxu0 %v1966_v8  ;;  %s197_s26 = scalar_lea.vmem [#allocation3], %s1543_s19  ;;  %s1423_s4 = scalar_lea.sflag [#allocation4], %s195_s18 }
  0x42   : > { %1249 = vmatprep.mubr.bf16.mxu1 %v1971_v12  ;;  %s1440_s27 = sshll.u32 %s197_s26, 4  ;;  %s1441_s27 = int_to_ptr.vmem [resolvable:$true] %s1440_s27 }
  0x43   : > { %1725 = vmatpush3.bf16.msra.mxu0 %v1940_v49  ;;  %s2009_s5 = scalar_lea.vmem %s1441_s27, 32  ;;  %p2016_p1 = scmp.lt.s32.totalorder %s1441_s27, %s2014_s15 }
  0x44   : > { %1753 = vmatpush3.bf16.msra.mxu1 %v1942_v51  ;;  %1726 = vmatprep.subr.bf16.mxu0 %v1943_v52  ;;  %p2010_p12 = scmp.ne.s32.totalorder %s1441_s27, %s2009_s5  ;;  %p2017_p2 = scmp.lt.s32.totalorder %s2015_s7, %s2009_s5 }
  0x45   : > { %1754 = vmatprep.subr.bf16.mxu1 %v1949_v56 }
  0x46   : > { %p2011_p13 = pnand %p2010_p12, %p2149_p4  ;;  %p2018_p3 = por %p2017_p2, %p2016_p1 }
  0x47   : > { %1727 = vmatpush3.bf16.msra.mxu0 %v1944_v53 }
  0x48   : > { %1755 = vmatpush3.bf16.msra.mxu1 %v1952_v59  ;;  %1728 = vmatprep.subr.bf16.mxu0 %v1953_v60  ;;  %p2012_p0 = pneg %p2011_p13 }
  0x49   : > { %1756 = vmatprep.subr.bf16.mxu1 %v1955_v62 }
  0x4a   : > { %p2019_p5 = pnand %p2018_p3, %p2012_p0 }
  0x4b   : > { %1729 = vmatpush3.bf16.msra.mxu0 %v1954_v61 }
  0x4c   : > { %1757 = vmatpush3.bf16.msra.mxu1 %v1956_v63  ;;  %1730 = vmatprep.subr.bf16.mxu0 %v1957_v0 }
  0x4d   : > { %1758 = vmatprep.subr.bf16.mxu1 %v1959_v2 }
  0x4f   : > { %1731 = vmatpush3.bf16.msra.mxu0 %v1958_v1 }
  0x50   : > { %1759 = vmatpush3.bf16.msra.mxu1 %v1960_v3  ;;  %1732 = vmatprep.subr.bf16.mxu0 %v1961_v4 }
  0x51   : > { %1760 = vmatprep.subr.bf16.mxu1 %v1963_v6 }
  0x53   : > { %1733 = vmatpush3.bf16.msra.mxu0 %v1962_v5 }
  0x54   : > { %1761 = vmatpush3.bf16.msra.mxu1 %v1967_v9  ;;  %1774 = vmatprep.subr.bf16.mxu0 %v1968_v10 }
  0x55   : > { %1812 = vmatprep.subr.bf16.mxu1 %v1973_v14 }
  0x56   : > { %1201 = vmatmul.mubr.bf16.vlgmr.msra.gmra.mxu0 %v1964_v7 }
  0x57   : > { %1775 = vmatpush3.bf16.msra.mxu0 %v1972_v13  ;;  %1250 = vmatmul.mubr.bf16.vlgmr.msra.gmra.mxu1 %v1969_v11 }
  0x58   : > { %1813 = vmatpush3.bf16.msra.mxu1 %v1973_v14  ;;  %1776 = vmatprep.subr.bf16.mxu0 %v1974_v15 }
  0x59   : > { %1814 = vmatprep.subr.bf16.mxu1 %v1976_v17  ;;  %1208 = vmatprep.mubr.bf16.mxu0 %v1977_v18 }
  0x5a   : > { %1257 = vmatprep.mubr.bf16.mxu1 %v1981_v21 }
  0x5b   : > { %1777 = vmatpush3.bf16.msra.mxu0 %v1975_v16 }
  0x5c   : > { %1815 = vmatpush3.bf16.msra.mxu1 %v1976_v17  ;;  %1778 = vmatprep.subr.bf16.mxu0 %v1980_v20 }
  0x5d   : > { %1816 = vmatprep.subr.bf16.mxu1 %v1985_v24 }
  0x5e   : > { %1209 = vmatmul.mubr.bf16.gmra.mxu0 %v1979_v19 }
  0x5f   : > { %1779 = vmatpush3.bf16.msra.mxu0 %v1983_v22  ;;  %1258 = vmatmul.mubr.bf16.gmra.mxu1 %v1984_v23 }
  0x60   : > { %1817 = vmatpush3.bf16.msra.mxu1 %v1985_v24  ;;  %1780 = vmatprep.subr.bf16.mxu0 %v1986_v25 }
  0x61   : > { %1818 = vmatprep.subr.bf16.mxu1 %v1988_v27  ;;  %1298 = vmatprep.mubr.bf16.mxu0 %v2003_v40 }
  0x62   : > { %1828 = vmatprep.mubr.bf16.mxu1 %v2004_v41 }
  0x63   : > { %1781 = vmatpush3.bf16.msra.mxu0 %v1987_v26 }
  0x64   : > { %1782 = vmatprep.subr.bf16.mxu0 %v1989_v28  ;;  %1819 = vmatpush3.bf16.msra.mxu1 %v1988_v27 }
  0x65   : > { %1820 = vmatprep.subr.bf16.mxu1 %v1991_v30 }
  0x67   : > { %1783 = vmatpush3.bf16.msra.mxu0 %v1990_v29 }
  0x68   : > { %1784 = vmatprep.subr.bf16.mxu0 %v1992_v31  ;;  %1821 = vmatpush3.bf16.msra.mxu1 %v1991_v30 }
  0x69   : > { %1822 = vmatprep.subr.bf16.mxu1 %v1994_v33 }
  0x6b   : > { %1785 = vmatpush3.bf16.msra.mxu0 %v1993_v32 }
  0x6c   : > { %1786 = vmatprep.subr.bf16.mxu0 %v1995_v34  ;;  %1823 = vmatpush3.bf16.msra.mxu1 %v1994_v33 }
  0x6d   : > { %1824 = vmatprep.subr.bf16.mxu1 %v1997_v35 }
  0x6f   : > { %1787 = vmatpush3.bf16.msra.mxu0 %v1996_v36 }
  0x70   : > { %1788 = vmatprep.subr.bf16.mxu0 %v1998_v37  ;;  %1825 = vmatpush3.bf16.msra.mxu1 %v1997_v35 }
  0x71   : > { %1826 = vmatprep.subr.bf16.mxu1 %v2000_v39 }
  0x73   : > { %1789 = vmatpush3.bf16.msra.mxu0 %v1999_v38 }
  0x74   : > { %1827 = vmatpush3.bf16.msra.mxu1 %v2000_v39 }
  0x76   : > { %1299 = vmatmul.mubr.bf16.vlgmr.msra.gmra.mxu0 %v2001_v42 }
  0x77   : > { %1306 = vmatprep.mubr.bf16.mxu0 %v2006_v43  ;;  %1829 = vmatmul.mubr.bf16.vlgmr.msra.gmra.mxu1 %v2005_v44  ;;  %v402_v43 = vld [vmem:[#allocation2] sm:$0xff] }
  0x7e   : > { %1307 = vmatmul.mubr.bf16.gmra.mxu0 %v2008_v45 }
  0xf6   : > { %v1678_v47 = vpop.f32.mrf.mxu0 }
  0xf7   : > { %v1706_v48 = vpop.f32.mrf.mxu1 }
  0xf8   : > { %v1679_v49 = vpop.f32.mrf.mxu0 }
  0xf9   : > { %v1707_v50 = vpop.f32.mrf.mxu1  ;;  %v1680_v11 = vadd.f32 %v1679_v49, %v1678_v47 }
  0xfa   : > { %v1681_v51 = vpop.f32.mrf.mxu0  ;;  %v1708_v12 = vadd.f32 %v1707_v50, %v1706_v48 }
  0xfb   : > { %v1709_v52 = vpop.f32.mrf.mxu1 }
  0xfc   : > { %v1682_v53 = vpop.f32.mrf.mxu0  ;;  %v1154_v16 = vadd.f32 %v1708_v12, %v1680_v11 }
  0xfd   : > { %v1710_v54 = vpop.f32.mrf.mxu1  ;;  %v1683_v17 = vadd.f32 %v1682_v53, %v1681_v51 }
  0xfe   : > { %v1684_v55 = vpop.f32.mrf.mxu0  ;;  %v1711_v18 = vadd.f32 %v1710_v54, %v1709_v52 }
  0xff   : > { %v1712_v56 = vpop.f32.mrf.mxu1 }
 0x100   : > { %v1685_v57 = vpop.f32.mrf.mxu0  ;;  %v1157_v27 = vadd.f32 %v1711_v18, %v1683_v17 }
 0x101   : > { %v1713_v58 = vpop.f32.mrf.mxu1  ;;  %v1686_v23 = vadd.f32 %v1685_v57, %v1684_v55  ;;  %v403_v55 = vld [vmem:[#allocation2 + $0x8] sm:$0xff] }
 0x102   : > { %v1687_v59 = vpop.f32.mrf.mxu0  ;;  %v1714_v24 = vadd.f32 %v1713_v58, %v1712_v56 }
 0x103   : > { %v1715_v60 = vpop.f32.mrf.mxu1 }
 0x104   : > { %v1688_v61 = vpop.f32.mrf.mxu0  ;;  %v1162_v35 = vadd.f32 %v1714_v24, %v1686_v23 }
 0x105   : > { %v1716_v62 = vpop.f32.mrf.mxu1  ;;  %v1689_v38 = vadd.f32 %v1688_v61, %v1687_v59 }
 0x106   : > { %v1717_v39 = vadd.f32 %v1716_v62, %v1715_v60 }
 0x108   : > { %v1165_v51 = vadd.f32 %v1717_v39, %v1689_v38 }
 0x116   : > { %v1734_v63 = vpop.f32.mrf.mxu0 }
 0x117   : > { %v1762_v0 = vpop.f32.mrf.mxu1 }
 0x118   : > { %v1735_v1 = vpop.f32.mrf.mxu0 }
 0x119   : > { %v1763_v2 = vpop.f32.mrf.mxu1  ;;  %v1736_v14 = vadd.f32 %v1735_v1, %v1734_v63  ;;  %v404_v1 = vld [vmem:[#allocation2 + $0x10] sm:$0xff] }
 0x11a   : > { %v1737_v3 = vpop.f32.mrf.mxu0  ;;  %v1764_v21 = vadd.f32 %v1763_v2, %v1762_v0 }
 0x11b   : > { %v1765_v4 = vpop.f32.mrf.mxu1  ;;  %v1203_v20 = vadd.f32 %v1736_v14, %v1154_v16 }
 0x11c   : > { %v1738_v5 = vpop.f32.mrf.mxu0 }
 0x11d   : > { %v1766_v6 = vpop.f32.mrf.mxu1  ;;  %v1739_v22 = vadd.f32 %v1738_v5, %v1737_v3  ;;  %v1252_v31 = vadd.f32 %v1764_v21, %v1203_v20 }
 0x11e   : > { %v1740_v7 = vpop.f32.mrf.mxu0  ;;  %v1767_v33 = vadd.f32 %v1766_v6, %v1765_v4 }
 0x11f   : > { %v1768_v8 = vpop.f32.mrf.mxu1  ;;  %v1206_v32 = vadd.f32 %v1739_v22, %v1157_v27 }
 0x120   : > { %v1741_v9 = vpop.f32.mrf.mxu0 }
 0x121   : > { %v1769_v10 = vpop.f32.mrf.mxu1  ;;  %v1742_v28 = vadd.f32 %v1741_v9, %v1740_v7  ;;  %v1255_v46 = vadd.f32 %v1767_v33, %v1206_v32 }
 0x122   : > { %v1743_v13 = vpop.f32.mrf.mxu0  ;;  %v1770_v42 = vadd.f32 %v1769_v10, %v1768_v8  ;;  %v405_v8 = vld [vmem:[#allocation2 + $0x18] sm:$0xff] }
 0x123   : > { %v1771_v15 = vpop.f32.mrf.mxu1  ;;  %v1211_v41 = vadd.f32 %v1742_v28, %v1162_v35 }
 0x124   : > { %v1744_v19 = vpop.f32.mrf.mxu0 }
 0x125   : > { %v1772_v25 = vpop.f32.mrf.mxu1  ;;  %v1745_v47 = vadd.f32 %v1744_v19, %v1743_v13  ;;  %v1260_v54 = vadd.f32 %v1770_v42, %v1211_v41 }
 0x126   : > { %v1773_v59 = vadd.f32 %v1772_v25, %v1771_v15 }
 0x127   : > { %v1214_v58 = vadd.f32 %v1745_v47, %v1165_v51 }
 0x129   : > { %v1263_v3 = vadd.f32 %v1773_v59, %v1214_v58 }
 0x136   : > { %v1790_v26 = vpop.f32.mrf.mxu0 }
 0x137   : > { %v1830_v30 = vpop.f32.mrf.mxu1 }
 0x138   : > { %v1791_v29 = vpop.f32.mrf.mxu0 }
 0x139   : > { %v1792_v34 = vadd.f32 %v1791_v29, %v1790_v26  ;;  %v1349_v37 = vpop.f32.mrf.mxu1 }
 0x13a   : > { %v1793_v36 = vpop.f32.mrf.mxu0 }
 0x13b   : > { %v1301_v40 = vadd.f32 %v1792_v34, %v1252_v31  ;;  %v1831_v45 = vpop.f32.mrf.mxu1 }
 0x13c   : > { %v1794_v44 = vpop.f32.mrf.mxu0 }
 0x13d   : > { %v1350_v48 = vadd.f32 %v1349_v37, %v1301_v40  ;;  %v1795_v49 = vadd.f32 %v1794_v44, %v1793_v36  ;;  %v1352_v56 = vpop.f32.mrf.mxu1 }
 0x13e   : > { %v1796_v50 = vpop.f32.mrf.mxu0 }
 0x13f   : > { %v1364_v52 = vadd.f32 %v1350_v48, %v402_v43  ;;  %v1304_v53 = vadd.f32 %v1795_v49, %v1255_v46 }
 0x140   : > { %v1797_v57 = vpop.f32.mrf.mxu0 }
 0x141   : > { %1369 = vst.msk [vmem:[#allocation2] sm:$0xff] %vm221_vm0, %v1364_v52  ;;  %v1353_v60 = vadd.f32 %v1352_v56, %v1304_v53  ;;  %v1798_v61 = vadd.f32 %v1797_v57, %v1796_v50 }
 0x142   : > { %v1799_v62 = vpop.f32.mrf.mxu0 }
 0x143   : > { %v1365_v63 = vadd.f32 %v1353_v60, %v403_v55  ;;  %v1309_v0 = vadd.f32 %v1798_v61, %v1260_v54 }
 0x144   : > { %v1800_v2 = vpop.f32.mrf.mxu0 }
 0x145   : > { %1370 = vst.msk [vmem:[#allocation2 + $0x8] sm:$0xff] %vm221_vm0, %v1365_v63  ;;  %v1358_v4 = vadd.f32 %v1830_v30, %v1309_v0  ;;  %v1801_v5 = vadd.f32 %v1800_v2, %v1799_v62 }
 0x147   : > { %v1366_v6 = vadd.f32 %v1358_v4, %v404_v1  ;;  %v1312_v7 = vadd.f32 %v1801_v5, %v1263_v3 }
 0x148   : > { %v1376_v9 = vld [vmem:[#allocation2] sm:$0xff] }
 0x149   : > { %1371 = vst.msk [vmem:[#allocation2 + $0x10] sm:$0xff] %vm221_vm0, %v1366_v6  ;;  %v1361_v10 = vadd.f32 %v1831_v45, %v1312_v7  ;;  %1380 = vst.msk [vmem:[%s214_s11] sm:$0xff] %vm221_vm0, %v1376_v9  ;;  %v1399_v15 = vmul.f32 %v1376_v9, %v1376_v9  ;;  %v1384_v17 = vsel %vm221_vm0, %v1376_v9, 0.0 }
 0x14b   : > { %v1367_v11 = vadd.f32 %v1361_v10, %v405_v8  ;;  %v1403_v22 = vsel %vm221_vm0, %v1399_v15, 0.0 }
 0x14c   : > { %v1377_v12 = vld [vmem:[#allocation2 + $0x8] sm:$0xff] }
 0x14d   : > { %1372 = vst.msk [vmem:[#allocation2 + $0x18] sm:$0xff] %vm221_vm0, %v1367_v11  ;;  %1381 = vst.msk [vmem:[%s214_s11 + $0x8] sm:$0xff] %vm221_vm0, %v1377_v12  ;;  %v1400_v13 = vmul.f32 %v1377_v12, %v1377_v12  ;;  %v1385_v14 = vsel %vm221_vm0, %v1377_v12, 0.0 }
 0x14e   : > { %v1386_v21 = vadd.f32 %v1385_v14, %v1384_v17 }
 0x14f   : > { %v1404_v20 = vsel %vm221_vm0, %v1400_v13, 0.0 }
 0x150   : > { %v1378_v16 = vld [vmem:[#allocation2 + $0x10] sm:$0xff]  ;;  %v1405_v26 = vadd.f32 %v1404_v20, %v1403_v22 }
 0x151   : > { %1382 = vst.msk [vmem:[%s214_s11 + $0x10] sm:$0xff] %vm221_vm0, %v1378_v16  ;;  %v1387_v18 = vsel %vm221_vm0, %v1378_v16, 0.0  ;;  %v1401_v19 = vmul.f32 %v1378_v16, %v1378_v16 }
 0x152   : > { %v1388_v25 = vadd.f32 %v1387_v18, %v1386_v21 }
 0x153   : > { %v1406_v23 = vsel %vm221_vm0, %v1401_v19, 0.0 }
 0x154   : > { %v1379_v24 = vld [vmem:[#allocation2 + $0x18] sm:$0xff]  ;;  %v1407_v30 = vadd.f32 %v1406_v23, %v1405_v26 }
 0x155   : > { %1383 = vst.msk [vmem:[%s214_s11 + $0x18] sm:$0xff] %vm221_vm0, %v1379_v24  ;;  %v1389_v27 = vsel %vm221_vm0, %v1379_v24, 0.0  ;;  %v1402_v28 = vmul.f32 %v1379_v24, %v1379_v24 }
 0x156   : > { %v1390_v29 = vadd.f32 %v1389_v27, %v1388_v25 }
 0x157   : > { %v1408_v31 = vsel %vm221_vm0, %v1402_v28, 0.0 }
 0x158   : > { %v1391_v32 = vrot.slane %v1390_v29, 4  ;;  %v1409_v33 = vadd.f32 %v1408_v31, %v1407_v30 }
 0x15a   : > { %v1392_v34 = vadd.f32 %v1391_v32, %v1390_v29  ;;  %v1410_v35 = vrot.slane %v1409_v33, 4 }
 0x15c   : > { %v1393_v36 = vrot.slane %v1392_v34, 2  ;;  %v1411_v37 = vadd.f32 %v1410_v35, %v1409_v33 }
 0x15e   : > { %v1394_v38 = vadd.f32 %v1393_v36, %v1392_v34  ;;  %v1412_v39 = vrot.slane %v1411_v37, 2 }
 0x160   : > { %v1395_v40 = vrot.slane %v1394_v38, 1  ;;  %v1413_v41 = vadd.f32 %v1412_v39, %v1411_v37 }
 0x162   : > { %v1396_v42 = vadd.f32 %v1395_v40, %v1394_v38  ;;  %v1414_v43 = vrot.slane %v1413_v41, 1 }
 0x164   : > { %1398 = vst.msk [vmem:[%s197_s26] sm:$0x1] %vm1397_vm1, %v1396_v42  ;;  %v1415_v44 = vadd.f32 %v1414_v43, %v1413_v41 }
 0x166   : > { %1416 = vst.msk [vmem:[%s197_s26 + $0x1] sm:$0x1] %vm1397_vm1, %v1415_v44 }
 0x167   : > { %2022 = shalt.err (!%p2019_p5)
}
 0x168   : > { %s2023_s8 = scalar_lea.hbm %s1438_s30, 32  ;;  %s2027_s10 = scalar_lea.hbm %s2525_s3, 64 }
 0x169   : > { %p2024_p6 = scmp.ne.s32.totalorder %s1438_s30, %s2023_s8  ;;  %p2028_p10 = scmp.lt.s32.totalorder %s1438_s30, %s2525_s3 }
 0x16a   : > { %p2029_p11 = scmp.lt.s32.totalorder %s2027_s10, %s2023_s8 }
 0x16b   : > { %p2025_p7 = pnand %p2024_p6, %p2149_p4 }
 0x16c   : > { %p2030_p12 = por %p2029_p11, %p2028_p10 }
 0x16d   : > { %p2026_p9 = pneg %p2025_p7 }
 0x16f   : > { %p2031_p13 = pnand %p2030_p12, %p2026_p9 }
 0x171   : > { %2034 = shalt.err (!%p2031_p13)
}
 0x172   : > { %1833 = dma.vmem_to_hbm [thread:$0]  (%p2149_p4), %s1441_s27, 32, %s1438_s30, %s1423_s4  }
 0x173 PF: > { %p1839_p0 = scmp.ge.s32.totalorder %s2085_s17, 2  ;;  %s1460_s19 = sand.u32 1, %s2065_s12  }
 0x174   : > { %s1461_s23 = scalar_lea.sflag [#allocation4], %s1460_s19 }
 0x175   : > { %p1836_p1 = pnand %p1839_p0, %p2156_p8 }
 0x177   : > { %p1837_p2 = pneg %p1836_p1 }
 0x179   : > { %2060 = dma.done.wait (%p1837_p2), %s1461_s23, 32  }
 0x17a   : > { %2062 = vsyncadd (%p1837_p2), %s1461_s23, 4294967264  ;;  %s17_s17 = sadd.s32 1, %s2085_s17   ;;  %s2528_s12 = smov %s2069_s13 }
 0x17b   : > { %p14_p3 = scmp.ge.s32.totalorder %s17_s17, 4   ;;  %s2529_s13 = smov %s2073_s14 }
 0x17c   : > { %s2530_s14 = smov %s2162_s25  ;;  %s2531_s15 = smov %s2081_s16 }
 0x17d   : > { %s2532_s16 = smov %s2534_s20  ;;  %16 = sbr.rel (!%p14_p3) target bundleno = 4 (0x4), region = 83 }
 0x182   :  { %1466 = vsyncpa [#allocation4], 1 }
 0x183   :  { %1468 = vsyncpa [#allocation4 + $0x1], 1 }

</bundles_post_ra>
